<compile_context>
chip_gen: v7x
topology: tpu7x:2x2x1
jax: 0.10.0
libtpu: 0.0.40
codegen_flags: <defaults>
</compile_context>

<pallas_src>
import jax
import jax.numpy as jnp
from jax.experimental import pallas as pl
from jax.experimental.pallas import tpu as pltpu


def _linear1x1_kernel(w_ref, b_ref, x_ref, o_ref):
    # w_ref, b_ref: (1,) scalars in SMEM; x_ref, o_ref: (rows_tile, 128) in VMEM.
    w = w_ref[0]
    b = b_ref[0]
    # Pure VPU: one vmul + one vadd per vreg. No MXU push, no XLU transpose.
    o_ref[...] = (x_ref[...] * w + b).astype(o_ref.dtype)


def linear1x1_forward(x, weight, bias, *, row_tile=512, lane=128):
    """y = x * weight + bias for nn.Linear(1, 1), lane-dense Pallas kernel."""
    B, in_f = x.shape
    out_f, in_f2 = weight.shape
    assert in_f == 1 and in_f2 == 1 and out_f == 1, "kernel specialised to Linear(1,1)"

    total = B
    rows = -(-total // lane)  # cdiv
    if rows <= row_tile:
        # Single full-extent block, padded to the (8,128) tile grid.
        rows_padded = -(-rows // 8) * 8
        block_rows = rows_padded
        n_blocks = 1
    else:
        # Tile the batch so BlockSpec double-buffers the DMA (mem-bound kernel).
        rows_padded = -(-rows // row_tile) * row_tile
        block_rows = row_tile
        n_blocks = rows_padded // row_tile

    flat = x.reshape(-1)
    pad = rows_padded * lane - total
    if pad:
        flat = jnp.pad(flat, (0, pad))
    x2d = flat.reshape(rows_padded, lane)

    w_s = weight.reshape(1).astype(jnp.float32)
    b_s = bias.reshape(1).astype(jnp.float32)

    out2d = pl.pallas_call(
        _linear1x1_kernel,
        out_shape=jax.ShapeDtypeStruct((rows_padded, lane), x.dtype),
        grid_spec=pltpu.PrefetchScalarGridSpec(
            num_scalar_prefetch=0,
            grid=(n_blocks,),
            in_specs=[
                pl.BlockSpec(memory_space=pltpu.MemorySpace.SMEM),  # weight scalar
                pl.BlockSpec(memory_space=pltpu.MemorySpace.SMEM),  # bias scalar
                pl.BlockSpec((block_rows, lane), lambda i: (i, 0)),
            ],
            out_specs=pl.BlockSpec((block_rows, lane), lambda i: (i, 0)),
        ),
        compiler_params=pltpu.CompilerParams(
            dimension_semantics=("parallel",),  # shards across TCs on v7x
            vmem_limit_bytes=32 * 1024 * 1024,
        ),
    )(w_s, b_s, x2d)

    # Drop padding and restore the (B, 1) PyTorch layout.
    return out2d.reshape(-1)[:total].reshape(B, 1)


class LR:
    """Pallas-backed equivalent of the PyTorch LR module (nn.Linear(1, 1))."""

    def __init__(self, in_size, out_size, key):
        # TODO(synk): general (in_size, out_size) > 1 would need a tiled MXU
        # matmul path; the reference module only instantiates Linear(1, 1).
        assert in_size == 1 and out_size == 1
        kw, kb = jax.random.split(key)
        bound = 1.0 / (in_size ** 0.5)
        self.weight = jax.random.uniform(
            kw, (out_size, in_size), jnp.float32, -bound, bound
        )
        self.bias = jax.random.uniform(
            kb, (out_size,), jnp.float32, -bound, bound
        )

    def __call__(self, x):
        return linear1x1_forward(x, self.weight, self.bias)

    def get_parameters(self):
        return (float(self.weight[0, 0]), float(self.bias[0]))


if __name__ == "__main__":
    key = jax.random.PRNGKey(0)
    model = LR(1, 1, key)

    # Same input as the PyTorch script: x = [[1.0], [2.0]]
    x = jnp.array([[1.0], [2.0]], dtype=jnp.float32)
    y = jax.block_until_ready(model(x))
    y_ref = x @ model.weight.T + model.bias
    assert y.shape == (2, 1)
    assert jnp.allclose(y, y_ref, atol=1e-6), (y, y_ref)

    # Larger, non-lane-aligned batch: exercises padding + the multi-block
    # (grid > 1) tiled path with the "parallel" batch axis.
    xb = jax.random.normal(jax.random.PRNGKey(1), (70_001, 1), jnp.float32)
    yb = jax.block_until_ready(model(xb))
    yb_ref = xb @ model.weight.T + model.bias
    assert yb.shape == (70_001, 1)
    assert jnp.allclose(yb, yb_ref, atol=1e-5), "large-batch mismatch"

    print("KERNEL_OK")
</pallas_src>

<mosaic_0001>
module attributes {stable_mosaic.version = 11 : i64} {
  func.func @_linear1x1_kernel(%arg0: i32, %arg1: memref<1xf32, #tpu.memory_space<smem>>, %arg2: memref<1xf32, #tpu.memory_space<smem>>, %arg3: memref<8x128xf32, #tpu.memory_space<vmem>>, %arg4: memref<8x128xf32, #tpu.memory_space<vmem>>) attributes {dimension_semantics = [#tpu.dimension_semantics<parallel>], iteration_bounds = array<i64: 1>, scalar_prefetch = 0 : i64, scratch_operands = 0 : i64, tpu.core_type = #tpu.core_type<tc>, window_params = [{transform_indices = @transform_0, window_bounds = array<i64: 1>}, {transform_indices = @transform_1, window_bounds = array<i64: 1>}, {transform_indices = @transform_2, window_bounds = array<i64: 8, 128>}, {transform_indices = @transform_3, window_bounds = array<i64: 8, 128>}]} {
    %c0 = arith.constant 0 : index
    %0 = memref.load %arg1[%c0] : memref<1xf32, #tpu.memory_space<smem>>
    %c0_0 = arith.constant 0 : index
    %1 = memref.load %arg2[%c0_0] : memref<1xf32, #tpu.memory_space<smem>>
    %c0_1 = arith.constant 0 : index
    %c0_2 = arith.constant 0 : index
    %2 = vector.load %arg3[%c0_1, %c0_2] : memref<8x128xf32, #tpu.memory_space<vmem>>, vector<8x128xf32>
    %3 = vector.broadcast %0 : f32 to vector<8x128xf32>
    %4 = arith.mulf %2, %3 : vector<8x128xf32>
    %5 = vector.broadcast %1 : f32 to vector<8x128xf32>
    %6 = arith.addf %4, %5 : vector<8x128xf32>
    %c0_3 = arith.constant 0 : index
    %c0_4 = arith.constant 0 : index
    %7 = vector.load %arg4[%c0_3, %c0_4] : memref<8x128xf32, #tpu.memory_space<vmem>>, vector<8x128xf32>
    tpu.vector_store %arg4[%c0_3, %c0_4], %6 {strides = array<i32>} : memref<8x128xf32, #tpu.memory_space<vmem>>, vector<8x128xf32>,
    return
  }
  func.func @transform_0(%arg0: i32) -> i32 {
    %c0_i32 = arith.constant 0 : i32
    %c0_i32_0 = arith.constant 0 : i32
    return %c0_i32 : i32
  }
  func.func @transform_1(%arg0: i32) -> i32 {
    %c0_i32 = arith.constant 0 : i32
    %c0_i32_0 = arith.constant 0 : i32
    return %c0_i32 : i32
  }
  func.func @transform_2(%arg0: i32) -> (i32, i32) {
    %c0_i32 = arith.constant 0 : i32
    %c0_i32_0 = arith.constant 0 : i32
    return %arg0, %c0_i32 : i32, i32
  }
  func.func @transform_3(%arg0: i32) -> (i32, i32) {
    %c0_i32 = arith.constant 0 : i32
    %c0_i32_0 = arith.constant 0 : i32
    return %arg0, %c0_i32 : i32, i32
  }
}

</mosaic_0001>

<bundles_post_ra>
// kernel: tpu_custom_call.1
= control target key start
LH: loop header
LB: loop body
LE: loop exit
PB: predicated region body
PF: predicated region fallthrough
CT: control target
= control target key end

     0   :  { %10 = vsyncpa [#allocation5], 0  ;;  %s154_s0 = inlined_call_operand.<no memory space> [shape: f32[1], index: 0, kind: input, shape index: {}]   ;;  %s155_s1 = inlined_call_operand.<no memory space> [shape: f32[1], index: 1, kind: input, shape index: {}]   ;;  %s156_s2 = inlined_call_operand.hbm [shape: f32[8,128], index: 2, kind: input, shape index: {}]   ;;  %s157_s3 = inlined_call_operand.hbm [shape: f32[8,128], index: 3, kind: output, shape index: {}]  }
   0x1   :  { %11 = vsyncpa [#allocation6], 0  ;;  %s102_s12 = smov [#allocation4]   ;;  %s54_s16 = scalar_lea.hbm %s156_s2, 128 }
   0x2   :  { %s22_s13 = sshll.u32 %s102_s12, 4  ;;  %p55_p0 = scmp.ne.s32.totalorder %s156_s2, %s54_s16  ;;  %s23_s13 = int_to_ptr.vmem [resolvable:$true] %s22_s13 }
   0x3   :  { %p58_p1 = scmp.lt.u32.totalorder %s54_s16, %s156_s2 }
   0x5   :  { %p60_p2 = pnand %p58_p1, %p55_p0 }
   0x7   :  { %63 = shalt.err (!%p60_p2)
}
   0x8   :  { %s64_s21 = scalar_lea.vmem %s23_s13, 128  ;;  %p69_p4 = scmp.lt.s32.totalorder %s23_s13, %s23_s13 }
   0x9   :  { %p65_p3 = scmp.ne.s32.totalorder %s23_s13, %s64_s21  ;;  %p70_p5 = scmp.lt.s32.totalorder %s64_s21, %s64_s21 }
   0xb   :  { %p71_p6 = por %p70_p5, %p69_p4 }
   0xd   :  { %p72_p7 = pnand %p71_p6, %p65_p3 }
   0xf   :  { %75 = shalt.err (!%p72_p7)
}
  0x10   :  { %25 = dma.hbm_to_vmem [thread:$0]  %s156_s2, 128, %s23_s13, [#allocation5]  }
  0x11   :  { %98 = dma.done.wait [#allocation5], 128  }
  0x12   :  { %99 = vsyncadd [#allocation5], 4294967168  ;;  %v32_v0 = vstv %s154_s0  ;;  %v31_v1 = vld [vmem:[#allocation4] sm:$0xff]  ;;  %v34_v2 = vstv %s155_s1  ;;  %s103_s28 = smov [#allocation7]  }
  0x13   :  { %s43_s29 = sshll.u32 %s103_s28, 4  ;;  %v33_v3 = vmul.f32 %v32_v0, %v31_v1  ;;  %s44_s29 = int_to_ptr.vmem [resolvable:$true] %s43_s29 }
  0x14   :  { %s76_s30 = scalar_lea.vmem %s44_s29, 128  ;;  %p81_p9 = scmp.lt.s32.totalorder %s44_s29, %s44_s29 }
  0x15   :  { %v35_v4 = vadd.f32 %v34_v2, %v33_v3  ;;  %p77_p8 = scmp.ne.s32.totalorder %s44_s29, %s76_s30  ;;  %p82_p10 = scmp.lt.s32.totalorder %s76_s30, %s76_s30 }
  0x17   :  { %36 = vst [vmem:[#allocation7] sm:$0xff] %v35_v4  ;;  %p83_p11 = por %p82_p10, %p81_p9 }
  0x19   :  { %p84_p12 = pnand %p83_p11, %p77_p8 }
  0x1b   :  { %87 = shalt.err (!%p84_p12)
}
  0x1c   :  { %s88_s4 = scalar_lea.hbm %s157_s3, 128 }
  0x1d   :  { %p89_p13 = scmp.ne.s32.totalorder %s157_s3, %s88_s4  ;;  %p92_p0 = scmp.lt.u32.totalorder %s88_s4, %s157_s3 }
  0x1f   :  { %p94_p1 = pnand %p92_p0, %p89_p13 }
  0x21   :  { %97 = shalt.err (!%p94_p1)
}
  0x22   :  { %46 = dma.vmem_to_hbm [thread:$0]  %s44_s29, 128, %s157_s3, [#allocation6]  }
  0x23   :  { %100 = dma.done.wait [#allocation6], 128  }
  0x24   :  { %101 = vsyncadd [#allocation6], 4294967168 }
  0x25   :  { %50 = vsyncpa [#allocation5], 1 }
  0x26   :  { %51 = vsyncpa [#allocation6], 1 }

</bundles_post_ra>
